<compile_context>
chip_gen: v7x
topology: tpu7x:2x2x1
jax: 0.10.0
libtpu: 0.0.40
codegen_flags: <defaults>
</compile_context>

<pallas_src>
import jax
import jax.numpy as jnp
from jax.experimental import pallas as pl
from jax.experimental.pallas import tpu as pltpu

_LANE = 128
_XLA_FALLBACK_BYTES = 128 * 1024       # below this, XLA's fused abs wins
_SINGLE_BLOCK_BYTES = 512 * 1024       # below this, one block is enough
_SMALL_BLOCK_BYTES = 2 * 1024 * 1024   # per-block cap, mid-sized inputs
_LARGE_BLOCK_BYTES = 4 * 1024 * 1024   # per-block cap, >=32 MiB inputs
_DEEP_GRID_BYTES = 8 * 1024 * 1024     # above this, require >=8 grid steps
_VMEM_LIMIT_BYTES = 32 * 1024 * 1024   # 4 x 4 MiB buffers + headroom; <= physical VMEM on v5e/v6e/v7x


def _abs_kernel(x_ref, o_ref):
    o_ref[...] = jnp.abs(x_ref[...])


def _choose_width(n):
    """Widest lane-dense last dim (multiple of 128) that divides n, else 0."""
    for cand in (4096, 2048, 1024, 512, 256, 128):
        if n % cand == 0:
            return cand
    return 0


def _choose_tile_rows(rows, width, itemsize, sublane):
    """Pick the row-tile.  The cdiv grid masks the last block, so the tile no
    longer has to divide `rows`; we just pick a roofline-friendly block size
    and make the grid deep enough for real cross-step DMA pipelining."""
    row_bytes = width * itemsize
    total_bytes = rows * row_bytes

    # Small inputs: one full-extent block; per-step overhead dominates anyway.
    if rows <= sublane or total_bytes <= _SINGLE_BLOCK_BYTES:
        return rows

    # Block cap: 2 MiB for mid-sized inputs, 4 MiB for large ones (amortizes
    # the ~0.35us/step overhead).  4 double-buffered in+out buffers of 4 MiB
    # = 16 MiB, which fits the explicit 32 MiB vmem limit on every generation
    # (v5e's default scoped limit is only 16 MiB; v7x physical VMEM is 64 MiB).
    block_cap = (
        _LARGE_BLOCK_BYTES if total_bytes >= 32 * 1024 * 1024 else _SMALL_BLOCK_BYTES
    )
    tile_rows = max((block_cap // row_bytes) // sublane * sublane, sublane)

    # Keep the grid deep enough that input prefetch / output writeback overlap
    # across steps on both v7x TensorCores (>=8 steps for big inputs, >=2
    # otherwise).
    min_steps = 8 if total_bytes >= _DEEP_GRID_BYTES else 2
    max_tile = max((rows // min_steps) // sublane * sublane, sublane)
    tile_rows = min(tile_rows, max_tile)

    # Prefer an even step count so neither v7x core runs an odd extra step.
    g = pl.cdiv(rows, tile_rows)
    if g > 2 and g % 2 == 1:
        t_alt = pl.cdiv(pl.cdiv(rows, g + 1), sublane) * sublane
        if t_alt >= sublane and pl.cdiv(rows, t_alt) % 2 == 0:
            tile_rows = t_alt
    return tile_rows


def pallas_abs(x, *, min_kernel_bytes=_XLA_FALLBACK_BYTES):
    """Elementwise |x| computed by a Pallas TPU kernel (any shape / dtype)."""
    orig_shape = x.shape
    dtype = x.dtype
    n = x.size
    if n == 0:
        return x

    itemsize = jnp.dtype(dtype).itemsize
    total_bytes = n * itemsize

    # Tiny inputs: a standalone kernel cannot beat XLA's fused elementwise abs
    # (fixed launch + single-step overhead >> transfer time).
    if total_bytes <= min_kernel_bytes:
        return jnp.abs(x)

    # Minimum sublane for legal packed tiles: 8 (32-bit), 16 (bf16), 32 (8-bit).
    sublane = max(8, 32 // max(itemsize, 1))

    flat = x.reshape(-1)
    width = _choose_width(n)
    pad = 0
    if width == 0:
        # Ragged element count (not a multiple of 128): pad only up to one lane
        # row (<128 elements); row-count raggedness is handled in-kernel by the
        # cdiv grid below.  Zero padding is numerically safe for abs.
        # TODO(synk): handle the <128-element tail in-kernel too (manual-DMA /
        # masked tail) so ragged sizes avoid the wrapper-side pad/slice copies.
        width = _LANE
        pad = pl.cdiv(n, _LANE) * _LANE - n
        flat = jnp.pad(flat, (0, pad))

    rows = flat.shape[0] // width
    x2d = flat.reshape(rows, width)

    tile_rows = _choose_tile_rows(rows, width, itemsize, sublane)
    grid = (pl.cdiv(rows, tile_rows),)
    kernel_bytes = rows * width * itemsize

    out2d = pl.pallas_call(
        _abs_kernel,
        out_shape=jax.ShapeDtypeStruct((rows, width), dtype),
        grid_spec=pl.GridSpec(
            grid=grid,
            in_specs=[pl.BlockSpec((tile_rows, width), lambda i: (i, 0))],
            out_specs=pl.BlockSpec((tile_rows, width), lambda i: (i, 0)),
        ),
        compiler_params=pltpu.CompilerParams(
            dimension_semantics=("parallel",),
            vmem_limit_bytes=_VMEM_LIMIT_BYTES,
        ),
        cost_estimate=pl.CostEstimate(
            flops=rows * width,
            bytes_accessed=2 * kernel_bytes,
            transcendentals=0,
        ),
        # NOTE: input_output_aliases={0: 0} would let abs run in place, but
        # outside an explicitly-donated jit it only forces a defensive copy,
        # so it is intentionally not used here.
    )(x2d)

    out = out2d.reshape(-1)
    if pad:
        out = out[:n]
    return out.reshape(orig_shape)


if __name__ == "__main__":
    key = jax.random.PRNGKey(0)

    # Primary test: the module's example shape, forced through the Pallas kernel.
    x = jax.random.normal(key, (2, 4, 16, 16), dtype=jnp.float32)
    out = jax.block_until_ready(pallas_abs(x, min_kernel_bytes=0))
    ref = jnp.abs(x)
    assert out.shape == x.shape
    assert out.dtype == x.dtype
    assert jnp.allclose(out, ref), "mismatch vs jnp.abs (2,4,16,16)"

    k1, k2, k3 = jax.random.split(key, 3)

    # Multi-block path (cdiv grid, even step count, default early-out skipped).
    x_big = jax.random.normal(k1, (512, 1024), dtype=jnp.float32)
    out_big = jax.block_until_ready(pallas_abs(x_big))
    assert jnp.allclose(out_big, jnp.abs(x_big)), "mismatch (512,1024)"

    # Row count that no tile divides -> masked last block via cdiv grid.
    x_odd = jax.random.normal(k2, (1000, 256), dtype=jnp.float32)
    out_odd = jax.block_until_ready(pallas_abs(x_odd))
    assert jnp.allclose(out_odd, jnp.abs(x_odd)), "mismatch (1000,256)"

    # Ragged element count (minimal-pad fallback path).
    x_rag = jax.random.normal(k3, (3, 5, 7), dtype=jnp.float32)
    out_rag = jax.block_until_ready(pallas_abs(x_rag, min_kernel_bytes=0))
    assert jnp.allclose(out_rag, jnp.abs(x_rag)), "mismatch (3,5,7)"

    print("KERNEL_OK")
</pallas_src>

<mosaic_0001>
module attributes {stable_mosaic.version = 11 : i64} {
  func.func @_abs_kernel(%arg0: i32, %arg1: memref<1x2048xf32, #tpu.memory_space<vmem>>, %arg2: memref<1x2048xf32, #tpu.memory_space<vmem>>) attributes {dimension_semantics = [#tpu.dimension_semantics<parallel>], iteration_bounds = array<i64: 1>, scalar_prefetch = 0 : i64, scratch_operands = 0 : i64, tpu.core_type = #tpu.core_type<tc>, window_params = [{transform_indices = @transform_0, window_bounds = array<i64: 1, 2048>}, {transform_indices = @transform_1, window_bounds = array<i64: 1, 2048>}]} {
    %c0 = arith.constant 0 : index
    %c0_0 = arith.constant 0 : index
    %0 = vector.load %arg1[%c0, %c0_0] : memref<1x2048xf32, #tpu.memory_space<vmem>>, vector<1x2048xf32>
    %1 = math.absf %0 : vector<1x2048xf32>
    %c0_1 = arith.constant 0 : index
    %c0_2 = arith.constant 0 : index
    %2 = vector.load %arg2[%c0_1, %c0_2] : memref<1x2048xf32, #tpu.memory_space<vmem>>, vector<1x2048xf32>
    tpu.vector_store %arg2[%c0_1, %c0_2], %1 {strides = array<i32>} : memref<1x2048xf32, #tpu.memory_space<vmem>>, vector<1x2048xf32>,
    return
  }
  func.func @transform_0(%arg0: i32) -> (i32, i32) {
    %c0_i32 = arith.constant 0 : i32
    %c0_i32_0 = arith.constant 0 : i32
    return %arg0, %c0_i32 : i32, i32
  }
  func.func @transform_1(%arg0: i32) -> (i32, i32) {
    %c0_i32 = arith.constant 0 : i32
    %c0_i32_0 = arith.constant 0 : i32
    return %arg0, %c0_i32 : i32, i32
  }
}

</mosaic_0001>

<bundles_post_ra>
// kernel: tpu_custom_call.1
= control target key start
LH: loop header
LB: loop body
LE: loop exit
PB: predicated region body
PF: predicated region fallthrough
CT: control target
= control target key end

     0   :  { %6 = vsyncpa [#allocation3], 0  ;;  %s128_s0 = inlined_call_operand.hbm [shape: f32[1,2048], index: 0, kind: input, shape index: {}]   ;;  %s129_s1 = inlined_call_operand.hbm [shape: f32[1,2048], index: 1, kind: output, shape index: {}]  }
   0x1   :  { %7 = vsyncpa [#allocation4], 0  ;;  %s92_s6 = smov [#allocation2]   ;;  %s44_s10 = scalar_lea.hbm %s128_s0, 256 }
   0x2   :  { %s14_s7 = sshll.u32 %s92_s6, 4  ;;  %p45_p0 = scmp.ne.s32.totalorder %s128_s0, %s44_s10  ;;  %s15_s7 = int_to_ptr.vmem [resolvable:$true] %s14_s7 }
   0x3   :  { %p48_p1 = scmp.lt.u32.totalorder %s44_s10, %s128_s0 }
   0x5   :  { %p50_p2 = pnand %p48_p1, %p45_p0 }
   0x7   :  { %53 = shalt.err (!%p50_p2)
}
   0x8   :  { %s54_s15 = scalar_lea.vmem %s15_s7, 256  ;;  %p59_p4 = scmp.lt.s32.totalorder %s15_s7, %s15_s7 }
   0x9   :  { %p55_p3 = scmp.ne.s32.totalorder %s15_s7, %s54_s15  ;;  %p60_p5 = scmp.lt.s32.totalorder %s54_s15, %s54_s15 }
   0xb   :  { %p61_p6 = por %p60_p5, %p59_p4 }
   0xd   :  { %p62_p7 = pnand %p61_p6, %p55_p3 }
   0xf   :  { %65 = shalt.err (!%p62_p7)
}
  0x10   :  { %17 = dma.hbm_to_vmem [thread:$0]  %s128_s0, 256, %s15_s7, [#allocation3]  }
  0x11   :  { %88 = dma.done.wait [#allocation3], 256  }
  0x12   :  { %89 = vsyncadd [#allocation3], 4294967040  ;;  %s93_s18 = smov [#allocation5]   ;;  %v21_v0 = vld [vmem:[#allocation2] sm:$0xff]  ;;  %v22_v1 = vld [vmem:[#allocation2 + $0x8] sm:$0xff] }
  0x13   :  { %s33_s19 = sshll.u32 %s93_s18, 4  ;;  %v23_v2 = vand.u32 2147483647, %v21_v0  ;;  %v24_v3 = vand.u32 2147483647, %v22_v1  ;;  %s34_s19 = int_to_ptr.vmem [resolvable:$true] %s33_s19 }
  0x14   :  { %s66_s20 = scalar_lea.vmem %s34_s19, 256  ;;  %p71_p9 = scmp.lt.s32.totalorder %s34_s19, %s34_s19 }
  0x15   :  { %25 = vst [vmem:[#allocation5] sm:$0xff] %v23_v2  ;;  %26 = vst [vmem:[#allocation5 + $0x8] sm:$0xff] %v24_v3  ;;  %p67_p8 = scmp.ne.s32.totalorder %s34_s19, %s66_s20  ;;  %p72_p10 = scmp.lt.s32.totalorder %s66_s20, %s66_s20 }
  0x17   :  { %p73_p11 = por %p72_p10, %p71_p9 }
  0x19   :  { %p74_p12 = pnand %p73_p11, %p67_p8 }
  0x1b   :  { %77 = shalt.err (!%p74_p12)
}
  0x1c   :  { %s78_s22 = scalar_lea.hbm %s129_s1, 256 }
  0x1d   :  { %p79_p13 = scmp.ne.s32.totalorder %s129_s1, %s78_s22  ;;  %p82_p0 = scmp.lt.u32.totalorder %s78_s22, %s129_s1 }
  0x1f   :  { %p84_p1 = pnand %p82_p0, %p79_p13 }
  0x21   :  { %87 = shalt.err (!%p84_p1)
}
  0x22   :  { %36 = dma.vmem_to_hbm [thread:$0]  %s34_s19, 256, %s129_s1, [#allocation4]  }
  0x23   :  { %90 = dma.done.wait [#allocation4], 256  }
  0x24   :  { %91 = vsyncadd [#allocation4], 4294967040 }
  0x25   :  { %40 = vsyncpa [#allocation3], 1 }
  0x26   :  { %41 = vsyncpa [#allocation4], 1 }

</bundles_post_ra>
